<compile_context>
chip_gen: v7x
topology: tpu7x:2x2x1
jax: 0.10.0
libtpu: 0.0.40
codegen_flags: <defaults>
</compile_context>

<pallas_src>
import numpy as np
import jax
import jax.numpy as jnp
from jax.experimental import pallas as pl
from jax.experimental.pallas import tpu as pltpu

# ----------------------------------------------------------------------------
# Stand-in for cfg = utils.read_yaml()  (deterministic synthetic config)
# ----------------------------------------------------------------------------
CFG = {
    "conv1_in": 4,  "conv1_out": 8,  "conv1_k": 3,
    "conv2_in": 8,  "conv2_out": 16, "conv2_k": 3, "conv2_stride": 1,
    "conv3_in": 16, "conv3_out": 16, "conv3_k": 3, "conv3_stride": 1,
    "max_pool": 2,
    "fc1_in": 16 * 3 * 3, "fc1_out": 32,
    "fc2_in": 32, "fc2_out": 10,
}
BN_EPS = 1e-5
H_IN = W_IN = 16      # spatial size implied by fc1_in = 16 * 3 * 3


# ----------------------------------------------------------------------------
# Offline parameter preparation (runs once; zero cost inside the forward pass)
# ----------------------------------------------------------------------------
def _fold_bn(conv_b, gamma, beta, mean, var):
    """Fold conv bias + eval-mode BatchNorm into a per-channel scale/shift."""
    inv = np.asarray(gamma, np.float32) / np.sqrt(np.asarray(var, np.float32) + BN_EPS)
    scale = inv
    shift = (np.asarray(conv_b, np.float32) - np.asarray(mean, np.float32)) * inv \
        + np.asarray(beta, np.float32)
    return scale.astype(np.float32), shift.astype(np.float32)


def _conv_band(w_oihw, scale, w_in):
    """Banded matrices turning a VALID stride-1 conv into K row-shifted matmuls.

    Activation layout: rows = (image, y), cols = x*Cin + ci.
    mats[di][(xo+dj)*Cin + ci, xo*Cout + co] = scale[co] * w[co, ci, di, dj].
    """
    w = np.asarray(w_oihw, np.float32) * scale[:, None, None, None]   # fold BN scale
    cout, cin, kh, kw = w.shape
    w_out = w_in - kw + 1
    mats = np.zeros((kh, w_in * cin, w_out * cout), np.float32)
    for di in range(kh):
        for dj in range(kw):
            tap = w[:, :, di, dj].T                                   # (cin, cout)
            for xo in range(w_out):
                mats[di,
                     (xo + dj) * cin:(xo + dj + 1) * cin,
                     xo * cout:(xo + 1) * cout] = tap
    return mats


def _pool_selectors(n, h_frame, rows_in, hw_valid, cout, pool):
    """0/1 selection matrices implementing a 2x2/stride-2 max-pool as
       max(S0 @ act, S1 @ act)  then  max(. @ P0, . @ P1)."""
    assert pool == 2  # TODO(synk): generalize selector construction for pool != 2
    hp = wp = hw_valid // pool
    s0 = np.zeros((n * hp, rows_in), np.float32)
    s1 = np.zeros((n * hp, rows_in), np.float32)
    for b in range(n):
        for p_ in range(hp):
            s0[b * hp + p_, b * h_frame + pool * p_] = 1.0
            s1[b * hp + p_, b * h_frame + pool * p_ + 1] = 1.0
    p0 = np.zeros((hw_valid * cout, wp * cout), np.float32)
    p1 = np.zeros((hw_valid * cout, wp * cout), np.float32)
    for x in range(wp):
        for c in range(cout):
            p0[(pool * x) * cout + c, x * cout + c] = 1.0
            p1[(pool * x + 1) * cout + c, x * cout + c] = 1.0
    return s0, s1, p0, p1


def prepare_fused_params(p, n):
    """One-time offline prep: fold BN, build banded conv matrices, pooling
    selection matrices, layout-matched fc1 taps.  Returns a tuple of arrays."""
    assert CFG["conv2_stride"] == 1 and CFG["conv3_stride"] == 1
    # TODO(synk): non-unit conv strides would need strided row/col selection here.
    k = CFG["conv1_k"]
    c1, c3 = CFG["conv1_out"], CFG["conv3_out"]
    pool = CFG["max_pool"]
    w1o = W_IN - k + 1                 # 14
    wp = w1o // pool                   # 7
    w2o = wp - k + 1                   # 5
    w3o = w2o - k + 1                  # 3
    assert CFG["fc1_in"] == c3 * w3o * w3o

    sc1, sh1 = _fold_bn(p["c1_b"], p["bn1_g"], p["bn1_b"], p["bn1_m"], p["bn1_v"])
    sc2, sh2 = _fold_bn(p["c2_b"], p["bn2_g"], p["bn2_b"], p["bn2_m"], p["bn2_v"])
    sc3, sh3 = _fold_bn(p["c3_b"], p["bn3_g"], p["bn3_b"], p["bn3_m"], p["bn3_v"])

    w1 = _conv_band(p["c1_w"], sc1, W_IN)          # (3, 64, 112)
    b1 = np.tile(sh1, w1o)[None, :]                # (1, 112)
    w2 = _conv_band(p["c2_w"], sc2, wp)            # (3, 56, 80)
    b2 = np.tile(sh2, w2o)[None, :]                # (1, 80)
    w3 = _conv_band(p["c3_w"], sc3, w2o)           # (3, 80, 48)
    b3 = np.tile(sh3, w3o)[None, :]                # (1, 48)

    rows1 = n * H_IN - (k - 1)
    s0, s1, p0, p1 = _pool_selectors(n, H_IN, rows1, w1o, c1, pool)

    # fc1 weights: permute PyTorch's NCHW-flatten input order (c, y, x) into the
    # kernel's (row-tap y ; col = x*C + c) layout -> no runtime transpose needed.
    fc1_w = np.asarray(p["fc1_w"], np.float32).reshape(CFG["fc1_out"], c3, w3o, w3o)
    wf = np.transpose(fc1_w, (2, 3, 1, 0)).reshape(w3o, w3o * c3, CFG["fc1_out"])
    bf = np.asarray(p["fc1_b"], np.float32)[None, :]

    rows4 = n * wp - 3 * (k - 1)                   # fc1 frame rows
    sel = np.zeros((n, rows4), np.float32)
    for b in range(n):
        sel[b, b * wp] = 1.0                       # anchor row of image b

    wo = np.asarray(p["fc2_w"], np.float32).T      # (32, 10)
    bo = np.asarray(p["fc2_b"], np.float32)[None, :]

    arrs = (w1, b1, s0, s1, p0, p1, w2, b2, w3, b3, wf, bf, sel, wo, bo)
    return tuple(jnp.asarray(a) for a in arrs)


# ----------------------------------------------------------------------------
# Fused forward: a single pallas_call, all intermediates in VMEM scratch
# ----------------------------------------------------------------------------
def net_forward(x_nchw, kparams):
    n, c_in, h, w = x_nchw.shape
    assert (h, w) == (H_IN, W_IN) and c_in == CFG["conv1_in"]
    k = CFG["conv1_k"]
    c1, c2, c3 = CFG["conv1_out"], CFG["conv2_out"], CFG["conv3_out"]
    pool = CFG["max_pool"]
    w1o = w - k + 1                      # 14
    wp = w1o // pool                     # 7
    w2o = wp - k + 1                     # 5
    w3o = w2o - k + 1                    # 3
    n_out = CFG["fc2_out"]

    rows0 = n * h                        # input frame rows          (32)
    rows1 = rows0 - (k - 1)              # conv1 frame rows          (30)
    rowsp = n * wp                       # pooled frame rows         (14)
    rows2 = rowsp - (k - 1)              # conv2 frame rows          (12)
    rows3 = rows2 - (k - 1)              # conv3 frame rows          (10)
    rows4 = rows3 - (k - 1)              # fc1 frame rows            (8)

    # NCHW -> channels-last 2-D row frame: row = (image, y), col = x*C + c
    x2d = jnp.transpose(x_nchw, (0, 2, 3, 1)).reshape(rows0, w * c_in)
    x2d = x2d.astype(jnp.float32)

    def kernel(x_ref, w1_ref, b1_ref, s0_ref, s1_ref, p0_ref, p1_ref,
               w2_ref, b2_ref, w3_ref, b3_ref, wf_ref, bf_ref,
               sel_ref, wo_ref, bo_ref,
               o_ref, yp_ref, y2_ref, y3_ref):
        f32 = jnp.float32

        def band_conv(src_ref, wt_ref, rows_out):
            # VALID stride-1 conv (+ folded BN scale) == k row-shifted matmuls
            # against precomputed banded weight matrices.
            acc = jnp.dot(src_ref[pl.ds(0, rows_out), :], wt_ref[0],
                          preferred_element_type=f32)
            for d in range(1, k):
                acc = acc + jnp.dot(src_ref[pl.ds(d, rows_out), :], wt_ref[d],
                                    preferred_element_type=f32)
            return acc

        # conv1 + BN1 + ReLU                                      (rows1, 14*c1)
        y1 = jnp.maximum(band_conv(x_ref, w1_ref, rows1) + b1_ref[...], 0.0)

        # 2x2 / stride-2 max-pool: row-pair max via selection matmuls, then
        # column-pair max via selection matmuls                   (rowsp, 7*c1)
        rmax = jnp.maximum(
            jnp.dot(s0_ref[...], y1, preferred_element_type=f32),
            jnp.dot(s1_ref[...], y1, preferred_element_type=f32))
        yp_ref[...] = jnp.maximum(
            jnp.dot(rmax, p0_ref[...], preferred_element_type=f32),
            jnp.dot(rmax, p1_ref[...], preferred_element_type=f32))
        # dropout1: identity at inference

        # conv2 + BN2 + ReLU                                      (rows2, 5*c2)
        y2_ref[...] = jnp.maximum(
            band_conv(yp_ref, w2_ref, rows2) + b2_ref[...], 0.0)

        # conv3 + BN3 + ReLU                                      (rows3, 3*c3)
        y3_ref[...] = jnp.maximum(
            band_conv(y2_ref, w3_ref, rows3) + b3_ref[...], 0.0)

        # flatten + fc1 + ReLU: same 3-row-tap banded pattern (fc1 weights were
        # pre-permuted offline to match this layout)              (rows4, 32)
        hval = jnp.maximum(band_conv(y3_ref, wf_ref, rows4) + bf_ref[...], 0.0)
        # dropout2: identity at inference

        # pick each image's anchor row, then fc2                  (n, n_out)
        hsel = jnp.dot(sel_ref[...], hval, preferred_element_type=f32)
        o_ref[...] = jnp.dot(hsel, wo_ref[...],
                             preferred_element_type=f32) + bo_ref[...]

    args = (x2d,) + tuple(kparams)

    def _zero_map(nd):
        return lambda i, _nd=nd: (0,) * _nd

    in_specs = [pl.BlockSpec(a.shape, _zero_map(a.ndim)) for a in args]

    return pl.pallas_call(
        kernel,
        out_shape=jax.ShapeDtypeStruct((n, n_out), jnp.float32),
        grid=(1,),
        in_specs=in_specs,
        out_specs=pl.BlockSpec((n, n_out), lambda i: (0, 0)),
        scratch_shapes=[
            pltpu.VMEM((rowsp, wp * c1), jnp.float32),    # pooled activations
            pltpu.VMEM((rows2, w2o * c2), jnp.float32),   # conv2 output
            pltpu.VMEM((rows3, w3o * c3), jnp.float32),   # conv3 output
        ],
        compiler_params=pltpu.CompilerParams(
            dimension_semantics=("arbitrary",)),
    )(*args)


# ----------------------------------------------------------------------------
# Synthetic parameters (stand-in for the trained PyTorch state dict)
# ----------------------------------------------------------------------------
def init_params():
    key = jax.random.PRNGKey(42)
    ks = jax.random.split(key, 24)
    p = {}

    def conv_w(k_, cout, cin, ksz):
        return (0.1 * jax.random.normal(k_, (cout, cin, ksz, ksz))).astype(jnp.float32)

    def vec(k_, n, scale=0.1):
        return (scale * jax.random.normal(k_, (n,))).astype(jnp.float32)

    p["c1_w"] = conv_w(ks[0], CFG["conv1_out"], CFG["conv1_in"], CFG["conv1_k"])
    p["c1_b"] = vec(ks[1], CFG["conv1_out"])
    p["c2_w"] = conv_w(ks[2], CFG["conv2_out"], CFG["conv2_in"], CFG["conv2_k"])
    p["c2_b"] = vec(ks[3], CFG["conv2_out"])
    p["c3_w"] = conv_w(ks[4], CFG["conv3_out"], CFG["conv3_in"], CFG["conv3_k"])
    p["c3_b"] = vec(ks[5], CFG["conv3_out"])
    for idx, cout, base in [(1, CFG["conv1_out"], 6), (2, CFG["conv2_out"], 10),
                            (3, CFG["conv3_out"], 14)]:
        p[f"bn{idx}_g"] = (1.0 + 0.1 * jax.random.normal(ks[base], (cout,))).astype(jnp.float32)
        p[f"bn{idx}_b"] = vec(ks[base + 1], cout)
        p[f"bn{idx}_m"] = vec(ks[base + 2], cout, 0.05)
        p[f"bn{idx}_v"] = (1.0 + 0.1 * jax.random.uniform(ks[base + 3], (cout,))).astype(jnp.float32)
    p["fc1_w"] = (0.1 * jax.random.normal(ks[18], (CFG["fc1_out"], CFG["fc1_in"]))).astype(jnp.float32)
    p["fc1_b"] = vec(ks[19], CFG["fc1_out"])
    p["fc2_w"] = (0.1 * jax.random.normal(ks[20], (CFG["fc2_out"], CFG["fc2_in"]))).astype(jnp.float32)
    p["fc2_b"] = vec(ks[21], CFG["fc2_out"])
    return p


# ----------------------------------------------------------------------------
# Pure-JAX reference (NCHW, mirrors the PyTorch ops) for a sanity check
# ----------------------------------------------------------------------------
def ref_forward(x_nchw, p):
    def conv_bn_relu(x, w, b, g, bt, m, v):
        y = jax.lax.conv_general_dilated(
            x, w, (1, 1), "VALID", dimension_numbers=("NCHW", "OIHW", "NCHW"))
        y = y + b[None, :, None, None]
        y = (y - m[None, :, None, None]) / jnp.sqrt(v[None, :, None, None] + BN_EPS)
        y = y * g[None, :, None, None] + bt[None, :, None, None]
        return jnp.maximum(y, 0.0)

    x = conv_bn_relu(x_nchw, p["c1_w"], p["c1_b"], p["bn1_g"], p["bn1_b"], p["bn1_m"], p["bn1_v"])
    n, c, h, w = x.shape
    x = x[:, :, : h // 2 * 2, : w // 2 * 2].reshape(n, c, h // 2, 2, w // 2, 2).max(axis=(3, 5))
    x = conv_bn_relu(x, p["c2_w"], p["c2_b"], p["bn2_g"], p["bn2_b"], p["bn2_m"], p["bn2_v"])
    x = conv_bn_relu(x, p["c3_w"], p["c3_b"], p["bn3_g"], p["bn3_b"], p["bn3_m"], p["bn3_v"])
    x = x.reshape(n, -1)
    x = jnp.maximum(x @ p["fc1_w"].T + p["fc1_b"], 0.0)
    return x @ p["fc2_w"].T + p["fc2_b"]


# ----------------------------------------------------------------------------
if __name__ == "__main__":
    params = init_params()
    x = jax.random.normal(jax.random.PRNGKey(0),
                          (2, CFG["conv1_in"], H_IN, W_IN), dtype=jnp.float32)

    kparams = prepare_fused_params(params, n=x.shape[0])   # one-time offline prep
    fwd = jax.jit(net_forward)
    out = jax.block_until_ready(fwd(x, kparams))
    assert out.shape == (2, CFG["fc2_out"]), out.shape

    ref = jax.block_until_ready(ref_forward(x, params))
    np.testing.assert_allclose(np.asarray(out), np.asarray(ref), rtol=1e-2, atol=1e-2)

    print("KERNEL_OK")
</pallas_src>

<mosaic_0001>
module attributes {stable_mosaic.version = 11 : i64} {
  func.func @kernel(%arg0: i32, %arg1: memref<32x64xf32, #tpu.memory_space<vmem>>, %arg2: memref<3x64x112xf32, #tpu.memory_space<vmem>>, %arg3: memref<1x112xf32, #tpu.memory_space<vmem>>, %arg4: memref<14x30xf32, #tpu.memory_space<vmem>>, %arg5: memref<14x30xf32, #tpu.memory_space<vmem>>, %arg6: memref<112x56xf32, #tpu.memory_space<vmem>>, %arg7: memref<112x56xf32, #tpu.memory_space<vmem>>, %arg8: memref<3x56x80xf32, #tpu.memory_space<vmem>>, %arg9: memref<1x80xf32, #tpu.memory_space<vmem>>, %arg10: memref<3x80x48xf32, #tpu.memory_space<vmem>>, %arg11: memref<1x48xf32, #tpu.memory_space<vmem>>, %arg12: memref<3x48x32xf32, #tpu.memory_space<vmem>>, %arg13: memref<1x32xf32, #tpu.memory_space<vmem>>, %arg14: memref<2x8xf32, #tpu.memory_space<vmem>>, %arg15: memref<32x10xf32, #tpu.memory_space<vmem>>, %arg16: memref<1x10xf32, #tpu.memory_space<vmem>>, %arg17: memref<2x10xf32, #tpu.memory_space<vmem>>, %arg18: memref<14x56xf32, #tpu.memory_space<vmem>>, %arg19: memref<12x80xf32, #tpu.memory_space<vmem>>, %arg20: memref<10x48xf32, #tpu.memory_space<vmem>>) attributes {dimension_semantics = [#tpu.dimension_semantics<arbitrary>], iteration_bounds = array<i64: 1>, scalar_prefetch = 0 : i64, scratch_operands = 3 : i64, tpu.core_type = #tpu.core_type<tc>, window_params = [{pipeline_mode = #tpu.pipeline_mode<synchronous>, transform_indices = @transform_0, window_bounds = array<i64: 32, 64>}, {pipeline_mode = #tpu.pipeline_mode<synchronous>, transform_indices = @transform_1, window_bounds = array<i64: 3, 64, 112>}, {pipeline_mode = #tpu.pipeline_mode<synchronous>, transform_indices = @transform_2, window_bounds = array<i64: 1, 112>}, {pipeline_mode = #tpu.pipeline_mode<synchronous>, transform_indices = @transform_3, window_bounds = array<i64: 14, 30>}, {pipeline_mode = #tpu.pipeline_mode<synchronous>, transform_indices = @transform_4, window_bounds = array<i64: 14, 30>}, {pipeline_mode = #tpu.pipeline_mode<synchronous>, transform_indices = @transform_5, window_bounds = array<i64: 112, 56>}, {pipeline_mode = #tpu.pipeline_mode<synchronous>, transform_indices = @transform_6, window_bounds = array<i64: 112, 56>}, {pipeline_mode = #tpu.pipeline_mode<synchronous>, transform_indices = @transform_7, window_bounds = array<i64: 3, 56, 80>}, {pipeline_mode = #tpu.pipeline_mode<synchronous>, transform_indices = @transform_8, window_bounds = array<i64: 1, 80>}, {pipeline_mode = #tpu.pipeline_mode<synchronous>, transform_indices = @transform_9, window_bounds = array<i64: 3, 80, 48>}, {pipeline_mode = #tpu.pipeline_mode<synchronous>, transform_indices = @transform_10, window_bounds = array<i64: 1, 48>}, {pipeline_mode = #tpu.pipeline_mode<synchronous>, transform_indices = @transform_11, window_bounds = array<i64: 3, 48, 32>}, {pipeline_mode = #tpu.pipeline_mode<synchronous>, transform_indices = @transform_12, window_bounds = array<i64: 1, 32>}, {pipeline_mode = #tpu.pipeline_mode<synchronous>, transform_indices = @transform_13, window_bounds = array<i64: 2, 8>}, {pipeline_mode = #tpu.pipeline_mode<synchronous>, transform_indices = @transform_14, window_bounds = array<i64: 32, 10>}, {pipeline_mode = #tpu.pipeline_mode<synchronous>, transform_indices = @transform_15, window_bounds = array<i64: 1, 10>}, {pipeline_mode = #tpu.pipeline_mode<synchronous>, transform_indices = @transform_16, window_bounds = array<i64: 2, 10>}]} {
    %c0 = arith.constant 0 : index
    %c0_0 = arith.constant 0 : index
    %0 = vector.load %arg1[%c0, %c0_0] : memref<32x64xf32, #tpu.memory_space<vmem>>, vector<30x64xf32>
    %c0_1 = arith.constant 0 : index
    %c0_2 = arith.constant 0 : index
    %c0_3 = arith.constant 0 : index
    %1 = vector.load %arg2[%c0_1, %c0_2, %c0_3] : memref<3x64x112xf32, #tpu.memory_space<vmem>>, vector<1x64x112xf32>
    %2 = vector.shape_cast %1 : vector<1x64x112xf32> to vector<64x112xf32>
    %cst = arith.constant dense<0.000000e+00> : vector<30x112xf32>
    %3 = tpu.matmul %0, %2, %cst {dimension_numbers = #tpu.dot_dimension_numbers<[1], [0], [0], [1], [0, 0, 1, 1], [], []>} : vector<30x64xf32>, vector<64x112xf32>, vector<30x112xf32> -> vector<30x112xf32>
    %c1 = arith.constant 1 : index
    %c0_4 = arith.constant 0 : index
    %4 = vector.load %arg1[%c1, %c0_4] : memref<32x64xf32, #tpu.memory_space<vmem>>, vector<30x64xf32>
    %c1_5 = arith.constant 1 : index
    %c0_6 = arith.constant 0 : index
    %c0_7 = arith.constant 0 : index
    %5 = vector.load %arg2[%c1_5, %c0_6, %c0_7] : memref<3x64x112xf32, #tpu.memory_space<vmem>>, vector<1x64x112xf32>
    %6 = vector.shape_cast %5 : vector<1x64x112xf32> to vector<64x112xf32>
    %cst_8 = arith.constant dense<0.000000e+00> : vector<30x112xf32>
    %7 = tpu.matmul %4, %6, %cst_8 {dimension_numbers = #tpu.dot_dimension_numbers<[1], [0], [0], [1], [0, 0, 1, 1], [], []>} : vector<30x64xf32>, vector<64x112xf32>, vector<30x112xf32> -> vector<30x112xf32>
    %8 = arith.addf %3, %7 : vector<30x112xf32>
    %c2 = arith.constant 2 : index
    %c0_9 = arith.constant 0 : index
    %9 = vector.load %arg1[%c2, %c0_9] : memref<32x64xf32, #tpu.memory_space<vmem>>, vector<30x64xf32>
    %c2_10 = arith.constant 2 : index
    %c0_11 = arith.constant 0 : index
    %c0_12 = arith.constant 0 : index
    %10 = vector.load %arg2[%c2_10, %c0_11, %c0_12] : memref<3x64x112xf32, #tpu.memory_space<vmem>>, vector<1x64x112xf32>
    %11 = vector.shape_cast %10 : vector<1x64x112xf32> to vector<64x112xf32>
    %cst_13 = arith.constant dense<0.000000e+00> : vector<30x112xf32>
    %12 = tpu.matmul %9, %11, %cst_13 {dimension_numbers = #tpu.dot_dimension_numbers<[1], [0], [0], [1], [0, 0, 1, 1], [], []>} : vector<30x64xf32>, vector<64x112xf32>, vector<30x112xf32> -> vector<30x112xf32>
    %13 = arith.addf %8, %12 : vector<30x112xf32>
    %c0_14 = arith.constant 0 : index
    %c0_15 = arith.constant 0 : index
    %14 = vector.load %arg3[%c0_14, %c0_15] : memref<1x112xf32, #tpu.memory_space<vmem>>, vector<1x112xf32>
    %15 = vector.broadcast %14 : vector<1x112xf32> to vector<30x112xf32>
    %16 = arith.addf %13, %15 : vector<30x112xf32>
    %cst_16 = arith.constant 0.000000e+00 : f32
    %17 = vector.broadcast %cst_16 : f32 to vector<30x112xf32>
    %18 = arith.maximumf %16, %17 : vector<30x112xf32>
    %c0_17 = arith.constant 0 : index
    %c0_18 = arith.constant 0 : index
    %19 = vector.load %arg4[%c0_17, %c0_18] : memref<14x30xf32, #tpu.memory_space<vmem>>, vector<14x30xf32>
    %cst_19 = arith.constant dense<0.000000e+00> : vector<14x112xf32>
    %20 = tpu.matmul %19, %18, %cst_19 {dimension_numbers = #tpu.dot_dimension_numbers<[1], [0], [0], [1], [0, 0, 1, 1], [], []>} : vector<14x30xf32>, vector<30x112xf32>, vector<14x112xf32> -> vector<14x112xf32>
    %c0_20 = arith.constant 0 : index
    %c0_21 = arith.constant 0 : index
    %21 = vector.load %arg5[%c0_20, %c0_21] : memref<14x30xf32, #tpu.memory_space<vmem>>, vector<14x30xf32>
    %cst_22 = arith.constant dense<0.000000e+00> : vector<14x112xf32>
    %22 = tpu.matmul %21, %18, %cst_22 {dimension_numbers = #tpu.dot_dimension_numbers<[1], [0], [0], [1], [0, 0, 1, 1], [], []>} : vector<14x30xf32>, vector<30x112xf32>, vector<14x112xf32> -> vector<14x112xf32>
    %23 = arith.maximumf %20, %22 : vector<14x112xf32>
    %c0_23 = arith.constant 0 : index
    %c0_24 = arith.constant 0 : index
    %24 = vector.load %arg6[%c0_23, %c0_24] : memref<112x56xf32, #tpu.memory_space<vmem>>, vector<112x56xf32>
    %cst_25 = arith.constant dense<0.000000e+00> : vector<14x56xf32>
    %25 = tpu.matmul %23, %24, %cst_25 {dimension_numbers = #tpu.dot_dimension_numbers<[1], [0], [0], [1], [0, 0, 1, 1], [], []>} : vector<14x112xf32>, vector<112x56xf32>, vector<14x56xf32> -> vector<14x56xf32>
    %c0_26 = arith.constant 0 : index
    %c0_27 = arith.constant 0 : index
    %26 = vector.load %arg7[%c0_26, %c0_27] : memref<112x56xf32, #tpu.memory_space<vmem>>, vector<112x56xf32>
    %cst_28 = arith.constant dense<0.000000e+00> : vector<14x56xf32>
    %27 = tpu.matmul %23, %26, %cst_28 {dimension_numbers = #tpu.dot_dimension_numbers<[1], [0], [0], [1], [0, 0, 1, 1], [], []>} : vector<14x112xf32>, vector<112x56xf32>, vector<14x56xf32> -> vector<14x56xf32>
    %28 = arith.maximumf %25, %27 : vector<14x56xf32>
    %c0_29 = arith.constant 0 : index
    %c0_30 = arith.constant 0 : index
    %29 = vector.load %arg18[%c0_29, %c0_30] : memref<14x56xf32, #tpu.memory_space<vmem>>, vector<14x56xf32>
    tpu.vector_store %arg18[%c0_29, %c0_30], %28 {strides = array<i32>} : memref<14x56xf32, #tpu.memory_space<vmem>>, vector<14x56xf32>,
    %c0_31 = arith.constant 0 : index
    %c0_32 = arith.constant 0 : index
    %30 = vector.load %arg18[%c0_31, %c0_32] : memref<14x56xf32, #tpu.memory_space<vmem>>, vector<12x56xf32>
    %c0_33 = arith.constant 0 : index
    %c0_34 = arith.constant 0 : index
    %c0_35 = arith.constant 0 : index
    %31 = vector.load %arg8[%c0_33, %c0_34, %c0_35] : memref<3x56x80xf32, #tpu.memory_space<vmem>>, vector<1x56x80xf32>
    %32 = vector.shape_cast %31 : vector<1x56x80xf32> to vector<56x80xf32>
    %cst_36 = arith.constant dense<0.000000e+00> : vector<12x80xf32>
    %33 = tpu.matmul %30, %32, %cst_36 {dimension_numbers = #tpu.dot_dimension_numbers<[1], [0], [0], [1], [0, 0, 1, 1], [], []>} : vector<12x56xf32>, vector<56x80xf32>, vector<12x80xf32> -> vector<12x80xf32>
    %c1_37 = arith.constant 1 : index
    %c0_38 = arith.constant 0 : index
    %34 = vector.load %arg18[%c1_37, %c0_38] : memref<14x56xf32, #tpu.memory_space<vmem>>, vector<12x56xf32>
    %c1_39 = arith.constant 1 : index
    %c0_40 = arith.constant 0 : index
    %c0_41 = arith.constant 0 : index
    %35 = vector.load %arg8[%c1_39, %c0_40, %c0_41] : memref<3x56x80xf32, #tpu.memory_space<vmem>>, vector<1x56x80xf32>
    %36 = vector.shape_cast %35 : vector<1x56x80xf32> to vector<56x80xf32>
    %cst_42 = arith.constant dense<0.000000e+00> : vector<12x80xf32>
    %37 = tpu.matmul %34, %36, %cst_42 {dimension_numbers = #tpu.dot_dimension_numbers<[1], [0], [0], [1], [0, 0, 1, 1], [], []>} : vector<12x56xf32>, vector<56x80xf32>, vector<12x80xf32> -> vector<12x80xf32>
    %38 = arith.addf %33, %37 : vector<12x80xf32>
    %c2_43 = arith.constant 2 : index
    %c0_44 = arith.constant 0 : index
    %39 = vector.load %arg18[%c2_43, %c0_44] : memref<14x56xf32, #tpu.memory_space<vmem>>, vector<12x56xf32>
    %c2_45 = arith.constant 2 : index
    %c0_46 = arith.constant 0 : index
    %c0_47 = arith.constant 0 : index
    %40 = vector.load %arg8[%c2_45, %c0_46, %c0_47] : memref<3x56x80xf32, #tpu.memory_space<vmem>>, vector<1x56x80xf32>
    %41 = vector.shape_cast %40 : vector<1x56x80xf32> to vector<56x80xf32>
    %cst_48 = arith.constant dense<0.000000e+00> : vector<12x80xf32>
    %42 = tpu.matmul %39, %41, %cst_48 {dimension_numbers = #tpu.dot_dimension_numbers<[1], [0], [0], [1], [0, 0, 1, 1], [], []>} : vector<12x56xf32>, vector<56x80xf32>, vector<12x80xf32> -> vector<12x80xf32>
    %43 = arith.addf %38, %42 : vector<12x80xf32>
    %c0_49 = arith.constant 0 : index
    %c0_50 = arith.constant 0 : index
    %44 = vector.load %arg9[%c0_49, %c0_50] : memref<1x80xf32, #tpu.memory_space<vmem>>, vector<1x80xf32>
    %45 = vector.broadcast %44 : vector<1x80xf32> to vector<12x80xf32>
    %46 = arith.addf %43, %45 : vector<12x80xf32>
    %cst_51 = arith.constant 0.000000e+00 : f32
    %47 = vector.broadcast %cst_51 : f32 to vector<12x80xf32>
    %48 = arith.maximumf %46, %47 : vector<12x80xf32>
    %c0_52 = arith.constant 0 : index
    %c0_53 = arith.constant 0 : index
    %49 = vector.load %arg19[%c0_52, %c0_53] : memref<12x80xf32, #tpu.memory_space<vmem>>, vector<12x80xf32>
    tpu.vector_store %arg19[%c0_52, %c0_53], %48 {strides = array<i32>} : memref<12x80xf32, #tpu.memory_space<vmem>>, vector<12x80xf32>,
    %c0_54 = arith.constant 0 : index
    %c0_55 = arith.constant 0 : index
    %50 = vector.load %arg19[%c0_54, %c0_55] : memref<12x80xf32, #tpu.memory_space<vmem>>, vector<10x80xf32>
    %c0_56 = arith.constant 0 : index
    %c0_57 = arith.constant 0 : index
    %c0_58 = arith.constant 0 : index
    %51 = vector.load %arg10[%c0_56, %c0_57, %c0_58] : memref<3x80x48xf32, #tpu.memory_space<vmem>>, vector<1x80x48xf32>
    %52 = vector.shape_cast %51 : vector<1x80x48xf32> to vector<80x48xf32>
    %cst_59 = arith.constant dense<0.000000e+00> : vector<10x48xf32>
    %53 = tpu.matmul %50, %52, %cst_59 {dimension_numbers = #tpu.dot_dimension_numbers<[1], [0], [0], [1], [0, 0, 1, 1], [], []>} : vector<10x80xf32>, vector<80x48xf32>, vector<10x48xf32> -> vector<10x48xf32>
    %c1_60 = arith.constant 1 : index
    %c0_61 = arith.constant 0 : index
    %54 = vector.load %arg19[%c1_60, %c0_61] : memref<12x80xf32, #tpu.memory_space<vmem>>, vector<10x80xf32>
    %c1_62 = arith.constant 1 : index
    %c0_63 = arith.constant 0 : index
    %c0_64 = arith.constant 0 : index
    %55 = vector.load %arg10[%c1_62, %c0_63, %c0_64] : memref<3x80x48xf32, #tpu.memory_space<vmem>>, vector<1x80x48xf32>
    %56 = vector.shape_cast %55 : vector<1x80x48xf32> to vector<80x48xf32>
    %cst_65 = arith.constant dense<0.000000e+00> : vector<10x48xf32>
    %57 = tpu.matmul %54, %56, %cst_65 {dimension_numbers = #tpu.dot_dimension_numbers<[1], [0], [0], [1], [0, 0, 1, 1], [], []>} : vector<10x80xf32>, vector<80x48xf32>, vector<10x48xf32> -> vector<10x48xf32>
    %58 = arith.addf %53, %57 : vector<10x48xf32>
    %c2_66 = arith.constant 2 : index
    %c0_67 = arith.constant 0 : index
    %59 = vector.load %arg19[%c2_66, %c0_67] : memref<12x80xf32, #tpu.memory_space<vmem>>, vector<10x80xf32>
    %c2_68 = arith.constant 2 : index
    %c0_69 = arith.constant 0 : index
    %c0_70 = arith.constant 0 : index
    %60 = vector.load %arg10[%c2_68, %c0_69, %c0_70] : memref<3x80x48xf32, #tpu.memory_space<vmem>>, vector<1x80x48xf32>
    %61 = vector.shape_cast %60 : vector<1x80x48xf32> to vector<80x48xf32>
    %cst_71 = arith.constant dense<0.000000e+00> : vector<10x48xf32>
    %62 = tpu.matmul %59, %61, %cst_71 {dimension_numbers = #tpu.dot_dimension_numbers<[1], [0], [0], [1], [0, 0, 1, 1], [], []>} : vector<10x80xf32>, vector<80x48xf32>, vector<10x48xf32> -> vector<10x48xf32>
    %63 = arith.addf %58, %62 : vector<10x48xf32>
    %c0_72 = arith.constant 0 : index
    %c0_73 = arith.constant 0 : index
    %64 = vector.load %arg11[%c0_72, %c0_73] : memref<1x48xf32, #tpu.memory_space<vmem>>, vector<1x48xf32>
    %65 = vector.broadcast %64 : vector<1x48xf32> to vector<10x48xf32>
    %66 = arith.addf %63, %65 : vector<10x48xf32>
    %cst_74 = arith.constant 0.000000e+00 : f32
    %67 = vector.broadcast %cst_74 : f32 to vector<10x48xf32>
    %68 = arith.maximumf %66, %67 : vector<10x48xf32>
    %c0_75 = arith.constant 0 : index
    %c0_76 = arith.constant 0 : index
    %69 = vector.load %arg20[%c0_75, %c0_76] : memref<10x48xf32, #tpu.memory_space<vmem>>, vector<10x48xf32>
    tpu.vector_store %arg20[%c0_75, %c0_76], %68 {strides = array<i32>} : memref<10x48xf32, #tpu.memory_space<vmem>>, vector<10x48xf32>,
    %c0_77 = arith.constant 0 : index
    %c0_78 = arith.constant 0 : index
    %70 = vector.load %arg20[%c0_77, %c0_78] : memref<10x48xf32, #tpu.memory_space<vmem>>, vector<8x48xf32>
    %c0_79 = arith.constant 0 : index
    %c0_80 = arith.constant 0 : index
    %c0_81 = arith.constant 0 : index
    %71 = vector.load %arg12[%c0_79, %c0_80, %c0_81] : memref<3x48x32xf32, #tpu.memory_space<vmem>>, vector<1x48x32xf32>
    %72 = vector.shape_cast %71 : vector<1x48x32xf32> to vector<48x32xf32>
    %cst_82 = arith.constant dense<0.000000e+00> : vector<8x32xf32>
    %73 = tpu.matmul %70, %72, %cst_82 {dimension_numbers = #tpu.dot_dimension_numbers<[1], [0], [0], [1], [0, 0, 1, 1], [], []>} : vector<8x48xf32>, vector<48x32xf32>, vector<8x32xf32> -> vector<8x32xf32>
    %c1_83 = arith.constant 1 : index
    %c0_84 = arith.constant 0 : index
    %74 = vector.load %arg20[%c1_83, %c0_84] : memref<10x48xf32, #tpu.memory_space<vmem>>, vector<8x48xf32>
    %c1_85 = arith.constant 1 : index
    %c0_86 = arith.constant 0 : index
    %c0_87 = arith.constant 0 : index
    %75 = vector.load %arg12[%c1_85, %c0_86, %c0_87] : memref<3x48x32xf32, #tpu.memory_space<vmem>>, vector<1x48x32xf32>
    %76 = vector.shape_cast %75 : vector<1x48x32xf32> to vector<48x32xf32>
    %cst_88 = arith.constant dense<0.000000e+00> : vector<8x32xf32>
    %77 = tpu.matmul %74, %76, %cst_88 {dimension_numbers = #tpu.dot_dimension_numbers<[1], [0], [0], [1], [0, 0, 1, 1], [], []>} : vector<8x48xf32>, vector<48x32xf32>, vector<8x32xf32> -> vector<8x32xf32>
    %78 = arith.addf %73, %77 : vector<8x32xf32>
    %c2_89 = arith.constant 2 : index
    %c0_90 = arith.constant 0 : index
    %79 = vector.load %arg20[%c2_89, %c0_90] : memref<10x48xf32, #tpu.memory_space<vmem>>, vector<8x48xf32>
    %c2_91 = arith.constant 2 : index
    %c0_92 = arith.constant 0 : index
    %c0_93 = arith.constant 0 : index
    %80 = vector.load %arg12[%c2_91, %c0_92, %c0_93] : memref<3x48x32xf32, #tpu.memory_space<vmem>>, vector<1x48x32xf32>
    %81 = vector.shape_cast %80 : vector<1x48x32xf32> to vector<48x32xf32>
    %cst_94 = arith.constant dense<0.000000e+00> : vector<8x32xf32>
    %82 = tpu.matmul %79, %81, %cst_94 {dimension_numbers = #tpu.dot_dimension_numbers<[1], [0], [0], [1], [0, 0, 1, 1], [], []>} : vector<8x48xf32>, vector<48x32xf32>, vector<8x32xf32> -> vector<8x32xf32>
    %83 = arith.addf %78, %82 : vector<8x32xf32>
    %c0_95 = arith.constant 0 : index
    %c0_96 = arith.constant 0 : index
    %84 = vector.load %arg13[%c0_95, %c0_96] : memref<1x32xf32, #tpu.memory_space<vmem>>, vector<1x32xf32>
    %85 = vector.broadcast %84 : vector<1x32xf32> to vector<8x32xf32>
    %86 = arith.addf %83, %85 : vector<8x32xf32>
    %cst_97 = arith.constant 0.000000e+00 : f32
    %87 = vector.broadcast %cst_97 : f32 to vector<8x32xf32>
    %88 = arith.maximumf %86, %87 : vector<8x32xf32>
    %c0_98 = arith.constant 0 : index
    %c0_99 = arith.constant 0 : index
    %89 = vector.load %arg14[%c0_98, %c0_99] : memref<2x8xf32, #tpu.memory_space<vmem>>, vector<2x8xf32>
    %cst_100 = arith.constant dense<0.000000e+00> : vector<2x32xf32>
    %90 = tpu.matmul %89, %88, %cst_100 {dimension_numbers = #tpu.dot_dimension_numbers<[1], [0], [0], [1], [0, 0, 1, 1], [], []>} : vector<2x8xf32>, vector<8x32xf32>, vector<2x32xf32> -> vector<2x32xf32>
    %c0_101 = arith.constant 0 : index
    %c0_102 = arith.constant 0 : index
    %91 = vector.load %arg15[%c0_101, %c0_102] : memref<32x10xf32, #tpu.memory_space<vmem>>, vector<32x10xf32>
    %cst_103 = arith.constant dense<0.000000e+00> : vector<2x10xf32>
    %92 = tpu.matmul %90, %91, %cst_103 {dimension_numbers = #tpu.dot_dimension_numbers<[1], [0], [0], [1], [0, 0, 1, 1], [], []>} : vector<2x32xf32>, vector<32x10xf32>, vector<2x10xf32> -> vector<2x10xf32>
    %c0_104 = arith.constant 0 : index
    %c0_105 = arith.constant 0 : index
    %93 = vector.load %arg16[%c0_104, %c0_105] : memref<1x10xf32, #tpu.memory_space<vmem>>, vector<1x10xf32>
    %94 = vector.broadcast %93 : vector<1x10xf32> to vector<2x10xf32>
    %95 = arith.addf %92, %94 : vector<2x10xf32>
    %c0_106 = arith.constant 0 : index
    %c0_107 = arith.constant 0 : index
    %96 = vector.load %arg17[%c0_106, %c0_107] : memref<2x10xf32, #tpu.memory_space<vmem>>, vector<2x10xf32>
    tpu.vector_store %arg17[%c0_106, %c0_107], %95 {strides = array<i32>} : memref<2x10xf32, #tpu.memory_space<vmem>>, vector<2x10xf32>,
    return
  }
  func.func @transform_0(%arg0: i32) -> (i32, i32) {
    %c0_i32 = arith.constant 0 : i32
    %c0_i32_0 = arith.constant 0 : i32
    %c0_i32_1 = arith.constant 0 : i32
    return %c0_i32, %c0_i32_0 : i32, i32
  }
  func.func @transform_1(%arg0: i32) -> (i32, i32, i32) {
    %c0_i32 = arith.constant 0 : i32
    %c0_i32_0 = arith.constant 0 : i32
    %c0_i32_1 = arith.constant 0 : i32
    %c0_i32_2 = arith.constant 0 : i32
    return %c0_i32, %c0_i32_0, %c0_i32_1 : i32, i32, i32
  }
  func.func @transform_2(%arg0: i32) -> (i32, i32) {
    %c0_i32 = arith.constant 0 : i32
    %c0_i32_0 = arith.constant 0 : i32
    %c0_i32_1 = arith.constant 0 : i32
    return %c0_i32, %c0_i32_0 : i32, i32
  }
  func.func @transform_3(%arg0: i32) -> (i32, i32) {
    %c0_i32 = arith.constant 0 : i32
    %c0_i32_0 = arith.constant 0 : i32
    %c0_i32_1 = arith.constant 0 : i32
    return %c0_i32, %c0_i32_0 : i32, i32
  }
  func.func @transform_4(%arg0: i32) -> (i32, i32) {
    %c0_i32 = arith.constant 0 : i32
    %c0_i32_0 = arith.constant 0 : i32
    %c0_i32_1 = arith.constant 0 : i32
    return %c0_i32, %c0_i32_0 : i32, i32
  }
  func.func @transform_5(%arg0: i32) -> (i32, i32) {
    %c0_i32 = arith.constant 0 : i32
    %c0_i32_0 = arith.constant 0 : i32
    %c0_i32_1 = arith.constant 0 : i32
    return %c0_i32, %c0_i32_0 : i32, i32
  }
  func.func @transform_6(%arg0: i32) -> (i32, i32) {
    %c0_i32 = arith.constant 0 : i32
    %c0_i32_0 = arith.constant 0 : i32
    %c0_i32_1 = arith.constant 0 : i32
    return %c0_i32, %c0_i32_0 : i32, i32
  }
  func.func @transform_7(%arg0: i32) -> (i32, i32, i32) {
    %c0_i32 = arith.constant 0 : i32
    %c0_i32_0 = arith.constant 0 : i32
    %c0_i32_1 = arith.constant 0 : i32
    %c0_i32_2 = arith.constant 0 : i32
    return %c0_i32, %c0_i32_0, %c0_i32_1 : i32, i32, i32
  }
  func.func @transform_8(%arg0: i32) -> (i32, i32) {
    %c0_i32 = arith.constant 0 : i32
    %c0_i32_0 = arith.constant 0 : i32
    %c0_i32_1 = arith.constant 0 : i32
    return %c0_i32, %c0_i32_0 : i32, i32
  }
  func.func @transform_9(%arg0: i32) -> (i32, i32, i32) {
    %c0_i32 = arith.constant 0 : i32
    %c0_i32_0 = arith.constant 0 : i32
    %c0_i32_1 = arith.constant 0 : i32
    %c0_i32_2 = arith.constant 0 : i32
    return %c0_i32, %c0_i32_0, %c0_i32_1 : i32, i32, i32
  }
  func.func @transform_10(%arg0: i32) -> (i32, i32) {
    %c0_i32 = arith.constant 0 : i32
    %c0_i32_0 = arith.constant 0 : i32
    %c0_i32_1 = arith.constant 0 : i32
    return %c0_i32, %c0_i32_0 : i32, i32
  }
  func.func @transform_11(%arg0: i32) -> (i32, i32, i32) {
    %c0_i32 = arith.constant 0 : i32
    %c0_i32_0 = arith.constant 0 : i32
    %c0_i32_1 = arith.constant 0 : i32
    %c0_i32_2 = arith.constant 0 : i32
    return %c0_i32, %c0_i32_0, %c0_i32_1 : i32, i32, i32
  }
  func.func @transform_12(%arg0: i32) -> (i32, i32) {
    %c0_i32 = arith.constant 0 : i32
    %c0_i32_0 = arith.constant 0 : i32
    %c0_i32_1 = arith.constant 0 : i32
    return %c0_i32, %c0_i32_0 : i32, i32
  }
  func.func @transform_13(%arg0: i32) -> (i32, i32) {
    %c0_i32 = arith.constant 0 : i32
    %c0_i32_0 = arith.constant 0 : i32
    %c0_i32_1 = arith.constant 0 : i32
    return %c0_i32, %c0_i32_0 : i32, i32
  }
  func.func @transform_14(%arg0: i32) -> (i32, i32) {
    %c0_i32 = arith.constant 0 : i32
    %c0_i32_0 = arith.constant 0 : i32
    %c0_i32_1 = arith.constant 0 : i32
    return %c0_i32, %c0_i32_0 : i32, i32
  }
  func.func @transform_15(%arg0: i32) -> (i32, i32) {
    %c0_i32 = arith.constant 0 : i32
    %c0_i32_0 = arith.constant 0 : i32
    %c0_i32_1 = arith.constant 0 : i32
    return %c0_i32, %c0_i32_0 : i32, i32
  }
  func.func @transform_16(%arg0: i32) -> (i32, i32) {
    %c0_i32 = arith.constant 0 : i32
    %c0_i32_0 = arith.constant 0 : i32
    %c0_i32_1 = arith.constant 0 : i32
    return %c0_i32, %c0_i32_0 : i32, i32
  }
}

</mosaic_0001>

<bundles_post_ra>
// kernel: net_forward.1
= control target key start
LH: loop header
LB: loop body
LE: loop exit
PB: predicated region body
PF: predicated region fallthrough
CT: control target
= control target key end

     0   :  { %s3297_s0 = inlined_call_operand.vmem [shape: f32[32,64], index: 0, kind: input, shape index: {}]   ;;  %s3298_s1 = inlined_call_operand.vmem [shape: f32[3,64,112], index: 1, kind: input, shape index: {}]   ;;  %s3299_s2 = inlined_call_operand.vmem [shape: f32[1,112], index: 2, kind: input, shape index: {}]   ;;  %s3300_s3 = inlined_call_operand.vmem [shape: f32[14,30], index: 3, kind: input, shape index: {}]   ;;  %s3301_s4 = inlined_call_operand.vmem [shape: f32[14,30], index: 4, kind: input, shape index: {}]   ;;  %s3302_s5 = inlined_call_operand.vmem [shape: f32[112,56], index: 5, kind: input, shape index: {}]   ;;  %s3303_s6 = inlined_call_operand.vmem [shape: f32[112,56], index: 6, kind: input, shape index: {}]   ;;  %s3304_s7 = inlined_call_operand.vmem [shape: f32[3,56,80], index: 7, kind: input, shape index: {}]   ;;  %s3305_s8 = inlined_call_operand.vmem [shape: f32[1,80], index: 8, kind: input, shape index: {}]   ;;  %s3306_s9 = inlined_call_operand.vmem [shape: f32[3,80,48], index: 9, kind: input, shape index: {}]   ;;  %s3307_s10 = inlined_call_operand.vmem [shape: f32[1,48], index: 10, kind: input, shape index: {}]   ;;  %s3308_s11 = inlined_call_operand.vmem [shape: f32[3,48,32], index: 11, kind: input, shape index: {}]   ;;  %s3309_s12 = inlined_call_operand.vmem [shape: f32[1,32], index: 12, kind: input, shape index: {}]   ;;  %s3310_s13 = inlined_call_operand.vmem [shape: f32[2,8], index: 13, kind: input, shape index: {}]   ;;  %s3311_s14 = inlined_call_operand.vmem [shape: f32[32,10], index: 14, kind: input, shape index: {}]   ;;  %s3312_s15 = inlined_call_operand.vmem [shape: f32[1,10], index: 15, kind: input, shape index: {}]   ;;  %s3313_s16 = inlined_call_operand.hbm [shape: f32[2,10], index: 16, kind: output, shape index: {}]  }
   0x1   :  { %3315 = sst [smem:[#allocation8_spill]] %s3297_s0 }
   0x2   :  { %v1782_v0 = vld [vmem:[%s3298_s1 + $0x40] sm:$0xff]  ;;  %v1783_v1 = vld [vmem:[%s3298_s1 + $0x48] sm:$0xff]  ;;  %v1784_v2 = vld [vmem:[%s3298_s1 + $0x50] sm:$0xff]  ;;  %vm79_vm0 = vcmask 523264   ;;  %s3316_s20 = sld [smem:[#allocation8_spill]] }
   0x3   :  { %v2390_v3 = vpack.c.bf16 %v1783_v1, %v1782_v0  ;;  %v1785_v4 = vld [vmem:[%s3298_s1 + $0x58] sm:$0xff]  ;;  %v1786_v6 = vld [vmem:[%s3298_s1 + $0x60] sm:$0xff]  ;;  %v1787_v7 = vld [vmem:[%s3298_s1 + $0x68] sm:$0xff] }
   0x4   :  { %v2394_v5 = vpack.c.bf16 %v1785_v4, %v1784_v2  ;;  %v2398_v9 = vpack.c.bf16 %v1787_v7, %v1786_v6  ;;  %v1788_v10 = vld [vmem:[%s3298_s1 + $0x70] sm:$0xff]  ;;  %v1789_v11 = vld [vmem:[%s3298_s1 + $0x78] sm:$0xff]  ;;  %v58_v13 = vld [vmem:[%s3298_s1] sm:$0xff] }
   0x5   :  { %2391 = vmatprep.subr.bf16.mxu0 %v2390_v3  ;;  %v2402_v12 = vpack.c.bf16 %v1789_v11, %v1788_v10  ;;  %v59_v14 = vld [vmem:[%s3298_s1 + $0x8] sm:$0xff] }
   0x6   :  { %2393 = vmatpush3.bf16.msra.mxu0 %v2390_v3 }
   0x7   :  { %2395 = vmatprep.subr.bf16.mxu0 %v2394_v5 }
   0x8   :  { %v66_v8 = vld [vmem:[%s3316_s20 + $0x1] sm:$0xff] }
   0x9   :  { %2075 = vmatprep.mubr.msk.f32.mxu0 %vm79_vm0, %v66_v8 }
   0xa   :  { %2397 = vmatpush3.bf16.msra.mxu0 %v2394_v5 }
   0xb   :  { %2399 = vmatprep.subr.bf16.mxu0 %v2398_v9 }
   0xe   :  { %2401 = vmatpush3.bf16.msra.mxu0 %v2398_v9 }
   0xf   :  { %21 = vsyncpa [#allocation6], 0  ;;  %2403 = vmatprep.subr.bf16.mxu0 %v2402_v12  ;;  %v2406_v15 = vpack.c.bf16 %v59_v14, %v58_v13  ;;  %v60_v16 = vld [vmem:[%s3298_s1 + $0x10] sm:$0xff]  ;;  %v61_v17 = vld [vmem:[%s3298_s1 + $0x18] sm:$0xff]  ;;  %vm405_vm1 = vcmask 244736   ;;  %vm412_vm2 = vcmask 1045504  }
  0x10   :  { %v67_v18 = vld [vmem:[%s3316_s20 + $0x9] sm:$0xff]  ;;  %v2410_v19 = vpack.c.bf16 %v61_v17, %v60_v16  ;;  %v68_v20 = vld [vmem:[%s3316_s20 + $0x11] sm:$0xff]  ;;  %v62_v21 = vld [vmem:[%s3298_s1 + $0x20] sm:$0xff]  ;;  %vm2688_vm3 = vmmov 1   ;;  %vm590_vm5 = vcmask 916480   ;;  %vm765_vm6 = vcmask 455680  }
  0x11   :  { %v63_v22 = vld [vmem:[%s3298_s1 + $0x28] sm:$0xff]  ;;  %v69_v23 = vld [vmem:[%s3316_s20 + $0x19] sm:$0x3f]  ;;  %v54_v25 = vld [vmem:[%s3316_s20] sm:$0xff]  ;;  %vm763_vm7 = vcmask 457728   ;;  %vm1054_vm8 = vcmask 650240  }
  0x12   :  { %2405 = vmatpush3.bf16.msra.mxu0 %v2402_v12  ;;  %v2414_v24 = vpack.c.bf16 %v63_v22, %v62_v21  ;;  %v64_v26 = vld [vmem:[%s3298_s1 + $0x30] sm:$0xff]  ;;  %v65_v27 = vld [vmem:[%s3298_s1 + $0x38] sm:$0xff]  ;;  %v1798_v29 = vld [vmem:[%s3298_s1 + $0x80] sm:$0xff]  ;;  %vm1052_vm9 = vcmask 654336   ;;  %vm2690_vm10 = vmmov 0   ;;  %vm1352_vm11 = vcmask 386048  }
  0x13   :  { %2407 = vmatprep.subr.bf16.mxu0 %v2406_v15  ;;  %v2418_v28 = vpack.c.bf16 %v65_v27, %v64_v26  ;;  %v1799_v30 = vld [vmem:[%s3298_s1 + $0x88] sm:$0xff]  ;;  %v1800_v32 = vld [vmem:[%s3298_s1 + $0x90] sm:$0xff]  ;;  %v1801_v33 = vld [vmem:[%s3298_s1 + $0x98] sm:$0xff]  ;;  %vm1350_vm12 = vcmask 392192   ;;  %vm1607_vm13 = vcmask 64512   ;;  %vm1692_vm14 = vcmask 261120  }
  0x14   :  { %v2422_v31 = vpack.c.bf16 %v1799_v30, %v1798_v29  ;;  %v55_v34 = vld [vmem:[%s3316_s20 + $0x8] sm:$0xff]  ;;  %v2426_v35 = vpack.c.bf16 %v1801_v33, %v1800_v32  ;;  %v56_v36 = vld [vmem:[%s3316_s20 + $0x10] sm:$0xff]  ;;  %v1802_v37 = vld [vmem:[%s3298_s1 + $0xa0] sm:$0xff]  ;;  %vm1766_vm15 = vcmask 74752  }
  0x15   :  { %2076 = vmatmul.mubr.msk.f32.vlgmr.msra.gmra.mrb[0].mxu0 %vm79_vm0, %v67_v18  ;;  %v1803_v38 = vld [vmem:[%s3298_s1 + $0xa8] sm:$0xff]  ;;  %v57_v39 = vld [vmem:[%s3316_s20 + $0x18] sm:$0x3f]  ;;  %v1804_v42 = vld [vmem:[%s3298_s1 + $0xb0] sm:$0xff] }
  0x16   :  { %2409 = vmatpush3.bf16.msra.mxu0 %v2406_v15  ;;  %2078 = vmatprep.mubr.msk.f32.mxu0 %vm79_vm0, %v68_v20  ;;  %v2430_v40 = vpack.c.bf16 %v1803_v38, %v1802_v37  ;;  %v274_v41 = vld [vmem:[%s3316_s20 + $0x2] sm:$0xff]  ;;  %v1805_v43 = vld [vmem:[%s3298_s1 + $0xb8] sm:$0xff]  ;;  %v275_v45 = vld [vmem:[%s3316_s20 + $0xa] sm:$0xff] }
  0x17   :  { %2411 = vmatprep.subr.bf16.mxu0 %v2410_v19  ;;  %v2434_v44 = vpack.c.bf16 %v1805_v43, %v1804_v42  ;;  %v276_v46 = vld [vmem:[%s3316_s20 + $0x12] sm:$0xff]  ;;  %v277_v47 = vld [vmem:[%s3316_s20 + $0x1a] sm:$0x3f]  ;;  %v403_v48 = vld [vmem:[%s3300_s3] sm:$0xff] }
  0x18   :  { %2133 = vmatprep.mubr.msk.f32.mxu1 %vm405_vm1, %v403_v48  ;;  %v1810_v49 = vld [vmem:[%s3299_s2] ss:$0 sm:$0xff]  ;;  %vm2905_vm4 = vmpackc.low %vm412_vm2, %vm2688_vm3  ;;  %v404_v1 = vld [vmem:[%s3300_s3 + $0x8] sm:$0x3f] }
  0x19   :  { %2079 = vmatmul.mubr.msk.f32.gmra.mrb[2].mxu0 %vm79_vm0, %v69_v23  ;;  %v491_v2 = vld [vmem:[%s3301_s4] sm:$0xff]  ;;  %v577_v4 = vld [vmem:[%s3302_s5 + $0x8] sm:$0xff]  ;;  %v578_v6 = vld [vmem:[%s3302_s5 + $0x10] sm:$0xff] }
  0x1a   :  { %2413 = vmatpush3.bf16.msra.mxu0 %v2410_v19  ;;  %2097 = vmatprep.mubr.msk.f32.mxu0 %vm79_vm0, %v54_v25  ;;  %v576_v3 = vld [vmem:[%s3302_s5] sm:$0xff]  ;;  %v579_v7 = vld [vmem:[%s3302_s5 + $0x18] sm:$0xff]  ;;  %v492_v8 = vld [vmem:[%s3301_s4 + $0x8] sm:$0x3f] }
  0x1b   :  { %2415 = vmatprep.subr.bf16.mxu0 %v2414_v24  ;;  %v2458_v5 = vpack.c.bf16 %v577_v4, %v576_v3  ;;  %v2462_v9 = vpack.c.bf16 %v579_v7, %v578_v6  ;;  %v580_v10 = vld [vmem:[%s3302_s5 + $0x20] sm:$0xff]  ;;  %v581_v11 = vld [vmem:[%s3302_s5 + $0x28] sm:$0xff]  ;;  %v582_v13 = vld [vmem:[%s3302_s5 + $0x30] sm:$0xff] }
  0x1c   :  { %v2466_v12 = vpack.c.bf16 %v581_v11, %v580_v10  ;;  %v583_v14 = vld [vmem:[%s3302_s5 + $0x38] sm:$0xff]  ;;  %v584_v16 = vld [vmem:[%s3302_s5 + $0x40] sm:$0xff]  ;;  %v585_v17 = vld [vmem:[%s3302_s5 + $0x48] sm:$0xff] }
  0x1d   :  { %v2470_v15 = vpack.c.bf16 %v583_v14, %v582_v13  ;;  %v2474_v18 = vpack.c.bf16 %v585_v17, %v584_v16  ;;  %v586_v19 = vld [vmem:[%s3302_s5 + $0x50] sm:$0xff]  ;;  %v587_v20 = vld [vmem:[%s3302_s5 + $0x58] sm:$0xff]  ;;  %v588_v22 = vld [vmem:[%s3302_s5 + $0x60] sm:$0xff] }
  0x1e   :  { %2417 = vmatpush3.bf16.msra.mxu0 %v2414_v24  ;;  %v2478_v21 = vpack.c.bf16 %v587_v20, %v586_v19  ;;  %v589_v23 = vld [vmem:[%s3302_s5 + $0x68] sm:$0xff]  ;;  %v672_v25 = vld [vmem:[%s3303_s6] sm:$0xff]  ;;  %v675_v32 = vld [vmem:[%s3303_s6 + $0x18] sm:$0xff] }
  0x1f   :  { %2419 = vmatprep.subr.bf16.mxu0 %v2418_v28  ;;  %v2482_v24 = vpack.c.bf16 %v589_v23, %v588_v22  ;;  %v673_v26 = vld [vmem:[%s3303_s6 + $0x8] sm:$0xff]  ;;  %v676_v37 = vld [vmem:[%s3303_s6 + $0x20] sm:$0xff]  ;;  %v771_v13 = vld [vmem:[%s3304_s7 + $0x10] sm:$0xff] }
  0x20   :  { %v2486_v27 = vpack.c.bf16 %v673_v26, %v672_v25  ;;  %v677_v38 = vld [vmem:[%s3303_s6 + $0x28] sm:$0xff]  ;;  %v680_v43 = vld [vmem:[%s3303_s6 + $0x40] sm:$0xff]  ;;  %v772_v14 = vld [vmem:[%s3304_s7 + $0x18] sm:$0xff] }
  0x21   :  { %v770_v63 = vld [vmem:[%s3304_s7 + $0x8] sm:$0xff]  ;;  %v1844_v3 = vld [vmem:[%s3306_s9 + $0x60] sm:$0xff]  ;;  %v2530_v16 = vpack.c.bf16 %v772_v14, %v771_v13  ;;  %v775_v22 = vld [vmem:[%s3304_s7 + $0x30] sm:$0xff] }
  0x22   :  { %2421 = vmatpush3.bf16.msra.mxu0 %v2418_v28  ;;  %v774_v19 = vld [vmem:[%s3304_s7 + $0x28] sm:$0xff]  ;;  %v1832_v23 = vld [vmem:[%s3304_s7 + $0x70] sm:$0xff]  ;;  %v1834_v25 = vld [vmem:[%s3304_s7 + $0x80] sm:$0xff] }
  0x23   :  { %2423 = vmatprep.subr.bf16.mxu0 %v2422_v31  ;;  %v1835_v26 = vld [vmem:[%s3304_s7 + $0x88] sm:$0xff]  ;;  %v1860_v13 = vld [vmem:[%s3306_s9 + $0xc0] sm:$0xff] }
  0x24   :  { %v1861_v14 = vld [vmem:[%s3306_s9 + $0xc8] sm:$0xff] }
  0x25   :  { %2098 = vmatmul.mubr.msk.f32.vlgmr.msra.gmra.mrb[0].mxu0 %vm79_vm0, %v55_v34 }
  0x26   :  { %2425 = vmatpush3.bf16.msra.mxu0 %v2422_v31  ;;  %2100 = vmatprep.mubr.msk.f32.mxu0 %vm79_vm0, %v56_v36  ;;  %v674_v31 = vld [vmem:[%s3303_s6 + $0x10] sm:$0xff] }
  0x27   :  { %2427 = vmatprep.subr.bf16.mxu0 %v2426_v35  ;;  %v2490_v36 = vpack.c.bf16 %v675_v32, %v674_v31  ;;  %v1837_v31 = vld [vmem:[%s3304_s7 + $0x98] sm:$0xff] }
  0x29   :  { %2101 = vmatmul.mubr.msk.f32.gmra.mrb[2].mxu0 %vm79_vm0, %v57_v39  ;;  %v2494_v39 = vpack.c.bf16 %v677_v38, %v676_v37  ;;  %v1847_v37 = vld [vmem:[%s3306_s9 + $0x78] sm:$0xff] }
  0x2a   :  { %2429 = vmatpush3.bf16.msra.mxu0 %v2426_v35  ;;  %2119 = vmatprep.mubr.msk.f32.mxu0 %vm79_vm0, %v274_v41  ;;  %v679_v41 = vld [vmem:[%s3303_s6 + $0x38] sm:$0xff] }
  0x2b   :  { %2431 = vmatprep.subr.bf16.mxu0 %v2430_v40 }
  0x2e   :  { %2433 = vmatpush3.bf16.msra.mxu0 %v2430_v40  ;;  %v678_v40 = vld [vmem:[%s3303_s6 + $0x30] sm:$0xff] }
  0x2f   :  { %2435 = vmatprep.subr.bf16.mxu0 %v2434_v44  ;;  %v2498_v42 = vpack.c.bf16 %v679_v41, %v678_v40  ;;  %v1849_v40 = vld [vmem:[%s3306_s9 + $0x88] sm:$0xff] }
  0x32   :  { %2437 = vmatpush3.bf16.msra.mxu0 %v2434_v44  ;;  %v681_v44 = vld [vmem:[%s3303_s6 + $0x48] sm:$0xff] }
  0x35   :  { %2120 = vmatmul.mubr.msk.f32.vlgmr.msra.gmra.mrb[0].mxu0 %vm79_vm0, %v275_v45  ;;  %v2502_v45 = vpack.c.bf16 %v681_v44, %v680_v43  ;;  %v1851_v43 = vld [vmem:[%s3306_s9 + $0x98] sm:$0xff] }
  0x36   :  { %2122 = vmatprep.mubr.msk.f32.mxu0 %vm79_vm0, %v276_v46  ;;  %v682_v46 = vld [vmem:[%s3303_s6 + $0x50] sm:$0xff] }
  0x39   :  { %2123 = vmatmul.mubr.msk.f32.gmra.mrb[2].mxu0 %vm79_vm0, %v277_v47  ;;  %v683_v47 = vld [vmem:[%s3303_s6 + $0x58] sm:$0xff] }
  0x3a   :  { %v2506_v48 = vpack.c.bf16 %v683_v47, %v682_v46  ;;  %v1059_v46 = vld [vmem:[%s3306_s9 + $0x8] sm:$0xff] }
 0x108   :  { %v2121_v50 = vpop.f32.mrb[0].mxu0 }
 0x109   :  { %v396_v51 = vadd.f32 %v2121_v50, %v1810_v49  ;;  %v365_v52 = vpop.f32.mrb[1].mxu0  ;;  %v685_v50 = vld [vmem:[%s3303_s6 + $0x68] sm:$0xff] }
 0x10a   :  { %v395_v53 = vadd.f32 %v1810_v49, %v365_v52  ;;  %v1821_v52 = vld [vmem:[%s3304_s7 + $0x38] sm:$0xff] }
 0x10b   :  { %v400_v54 = vmax.f32 %v396_v51, 0.0 }
 0x10c   :  { %v399_v55 = vmax.f32 %v395_v53, 0.0  ;;  %v2124_v56 = vpop.f32.mrb[2].mxu0  ;;  %v1822_v53 = vld [vmem:[%s3304_s7 + $0x40] sm:$0xff] }
 0x10d   :  { %v398_v57 = vadd.f32 %v2124_v56, %v1810_v49  ;;  %v375_v58 = vpop.f32.mrb[3].mxu0  ;;  %v1824_v56 = vld [vmem:[%s3304_s7 + $0x50] sm:$0xff] }
 0x10e   :  { %v2438_v59 = vpack.c.bf16 %v400_v54, %v399_v55  ;;  %v397_v60 = vadd.f32 %v1810_v49, %v375_v58  ;;  %v684_v49 = vld [vmem:[%s3303_s6 + $0x60] sm:$0xff]  ;;  %v2514_v54 = vpack.c.bf16 %v1822_v53, %v1821_v52  ;;  %v1823_v55 = vld [vmem:[%s3304_s7 + $0x48] sm:$0xff]  ;;  %v1825_v58 = vld [vmem:[%s3304_s7 + $0x58] sm:$0xff] }
 0x10f   :  { %v402_v61 = vmax.f32 %v398_v57, 0.0  ;;  %v2510_v51 = vpack.c.bf16 %v685_v50, %v684_v49  ;;  %v2518_v57 = vpack.c.bf16 %v1824_v56, %v1823_v55  ;;  %v1060_v55 = vld [vmem:[%s3306_s9 + $0x10] sm:$0xff]  ;;  %v1061_v56 = vld [vmem:[%s3306_s9 + $0x18] sm:$0xff] }
 0x110   :  { %v401_v62 = vmax.f32 %v397_v60, 0.0  ;;  %2439 = vmatprep.subr.bf16.mxu1 %v2438_v59  ;;  %2515 = vmatprep.subr.bf16.mxu0 %v2514_v54 }
 0x111   :  { %2441 = vmatpush3.bf16.msra.mxu1 %v2438_v59  ;;  %2517 = vmatpush3.bf16.msra.mxu0 %v2514_v54 }
 0x112   :  { %v2442_v0 = vpack.c.bf16 %v402_v61, %v401_v62  ;;  %2519 = vmatprep.subr.bf16.mxu0 %v2518_v57  ;;  %v1827_v61 = vld [vmem:[%s3304_s7 + $0x68] sm:$0xff]  ;;  %v769_v62 = vld [vmem:[%s3304_s7] sm:$0xff] }
 0x114   :  { %2444 = vmatprep.subr.msk.bf16.mxu1 %vm2905_vm4, %v2442_v0 }
 0x115   :  { %2447 = vmatpush3.bf16.msk.msra.mxu1 %vm2905_vm4, %v2442_v0  ;;  %2521 = vmatpush3.bf16.msra.mxu0 %v2518_v57 }
 0x116   :  { %2449 = vmatprep.subr.bf16.mxu1 %v2438_v59 }
 0x118   :  { %2134 = vmatmul.mubr.msk.f32.vlgmr.msra.gmra.mrb[0].mxu1 %vm405_vm1, %v404_v1  ;;  %v1842_v1 = vld [vmem:[%s3306_s9 + $0x50] sm:$0xff] }
 0x119   :  { %2451 = vmatpush3.bf16.msra.mxu1 %v2438_v59  ;;  %2144 = vmatprep.mubr.msk.f32.mxu1 %vm405_vm1, %v491_v2  ;;  %v1826_v59 = vld [vmem:[%s3304_s7 + $0x60] sm:$0xff]  ;;  %v1843_v2 = vld [vmem:[%s3306_s9 + $0x58] sm:$0xff] }
 0x11a   :  { %2454 = vmatprep.subr.msk.bf16.mxu1 %vm2905_vm4, %v2442_v0  ;;  %v2522_v60 = vpack.c.bf16 %v1826_v59, %v1825_v58  ;;  %v2550_v4 = vpack.c.bf16 %v1843_v2, %v1842_v1  ;;  %v2574_v58 = vpack.c.bf16 %v1061_v56, %v1060_v55  ;;  %v1065_v1 = vld [vmem:[%s3306_s9 + $0x38] sm:$0xff]  ;;  %v1879_v55 = vld [vmem:[%s3308_s11 + $0x70] sm:$0xff] }
 0x11b   :  { %v1880_v56 = vld [vmem:[%s3308_s11 + $0x78] sm:$0xff] }
 0x11c   :  { %2523 = vmatprep.subr.bf16.mxu0 %v2522_v60 }
 0x11d   :  { %2457 = vmatpush3.bf16.msk.msra.mxu1 %vm2905_vm4, %v2442_v0  ;;  %2525 = vmatpush3.bf16.msra.mxu0 %v2522_v60  ;;  %v2526_v0 = vpack.c.bf16 %v770_v63, %v769_v62  ;;  %v1062_v60 = vld [vmem:[%s3306_s9 + $0x20] sm:$0xff] }
 0x11e   :  { %2459 = vmatprep.subr.bf16.mxu1 %v2458_v5  ;;  %2221 = vmatprep.subr.mxu0 %v1827_v61 }
 0x120   :  { %2145 = vmatmul.mubr.msk.f32.vlgmr.msra.gmra.mrb[2].mxu1 %vm405_vm1, %v492_v8 }
 0x121   :  { %2461 = vmatpush3.bf16.msra.mxu1 %v2458_v5  ;;  %2222 = vmatpush3.msra.mxu0 %v1827_v61  ;;  %v1845_v5 = vld [vmem:[%s3306_s9 + $0x68] sm:$0xff] }
 0x122   :  { %2463 = vmatprep.subr.bf16.mxu1 %v2462_v9  ;;  %2527 = vmatprep.subr.bf16.mxu0 %v2526_v0  ;;  %v2554_v6 = vpack.c.bf16 %v1845_v5, %v1844_v3  ;;  %v1063_v61 = vld [vmem:[%s3306_s9 + $0x28] sm:$0xff]  ;;  %v1066_v3 = vld [vmem:[%s3306_s9 + $0x40] sm:$0xff] }
 0x123   :  { %v2578_v63 = vpack.c.bf16 %v1063_v61, %v1062_v60  ;;  %v1882_v60 = vld [vmem:[%s3308_s11 + $0x88] sm:$0xff] }
 0x125   :  { %2465 = vmatpush3.bf16.msra.mxu1 %v2462_v9 }
 0x126   :  { %2467 = vmatprep.subr.bf16.mxu1 %v2466_v12 }
 0x129   :  { %2469 = vmatpush3.bf16.msra.mxu1 %v2466_v12 }
 0x12a   :  { %2471 = vmatprep.subr.bf16.mxu1 %v2470_v15 }
 0x12d   :  { %2473 = vmatpush3.bf16.msra.mxu1 %v2470_v15 }
 0x12e   :  { %2475 = vmatprep.subr.bf16.mxu1 %v2474_v18 }
 0x131   :  { %2477 = vmatpush3.bf16.msra.mxu1 %v2474_v18  ;;  %v773_v18 = vld [vmem:[%s3304_s7 + $0x20] sm:$0xff] }
 0x132   :  { %2479 = vmatprep.subr.bf16.mxu1 %v2478_v21 }
 0x135   :  { %2481 = vmatpush3.bf16.msra.mxu1 %v2478_v21  ;;  %v2534_v21 = vpack.c.bf16 %v774_v19, %v773_v18  ;;  %v1863_v18 = vld [vmem:[%s3306_s9 + $0xd8] sm:$0xff] }
 0x136   :  { %2483 = vmatprep.subr.bf16.mxu1 %v2482_v24 }
 0x139   :  { %2485 = vmatpush3.bf16.msra.mxu1 %v2482_v24  ;;  %v1833_v24 = vld [vmem:[%s3304_s7 + $0x78] sm:$0xff] }
 0x13a   :  { %2487 = vmatprep.subr.bf16.mxu1 %v2486_v27 }
 0x1eb   :  { %v2135_v28 = vpop.f32.mrb[0].mxu1 }
 0x1ec   :  { %v482_v29 = vpop.f32.mrb[1].mxu1 }
 0x1f3   :  { %v2146_v30 = vpop.f32.mrb[2].mxu1 }
 0x1f4   :  { %v575_v33 = vmax.f32 %v2135_v28, %v2146_v30  ;;  %v565_v34 = vpop.f32.mrb[3].mxu1  ;;  %v2542_v28 = vpack.c.bf16 %v1835_v26, %v1834_v25  ;;  %v1836_v30 = vld [vmem:[%s3304_s7 + $0x90] sm:$0xff]  ;;  %v1870_v25 = vld [vmem:[%s3308_s11 + $0x38] sm:$0xff] }
 0x1f5   :  { %v574_v35 = vmax.f32 %v482_v29, %v565_v34  ;;  %v1838_v34 = vld [vmem:[%s3304_s7 + $0xa0] sm:$0xff] }
 0x1f7   :  { %2175 = vmatprep.mubr.msk.f32.mxu1 %vm590_vm5, %v574_v35 }
 0x1f8   :  { %2176 = vmatmul.mubr.msk.f32.vlgmr.msra.gmra.mrb[4].mxu1 %vm590_vm5, %v575_v33 }
 0x1f9   :  { %2489 = vmatpush3.bf16.msra.mxu1 %v2486_v27  ;;  %2206 = vmatprep.mubr.msk.f32.mxu1 %vm590_vm5, %v574_v35  ;;  %v2538_v27 = vpack.c.bf16 %v1833_v24, %v1832_v23  ;;  %v1869_v24 = vld [vmem:[%s3308_s11 + $0x30] sm:$0xff] }
 0x1fa   :  { %2491 = vmatprep.subr.bf16.mxu1 %v2490_v36  ;;  %v2611_v26 = vpack.c.bf16 %v1870_v25, %v1869_v24 }
 0x1fd   :  { %2493 = vmatpush3.bf16.msra.mxu1 %v2490_v36  ;;  %v1846_v36 = vld [vmem:[%s3306_s9 + $0x70] sm:$0xff] }
 0x1fe   :  { %2495 = vmatprep.subr.bf16.mxu1 %v2494_v39  ;;  %v2558_v38 = vpack.c.bf16 %v1847_v37, %v1846_v36 }
 0x201   :  { %2497 = vmatpush3.bf16.msra.mxu1 %v2494_v39  ;;  %v1848_v39 = vld [vmem:[%s3306_s9 + $0x80] sm:$0xff] }
 0x202   :  { %2499 = vmatprep.subr.bf16.mxu1 %v2498_v42  ;;  %v2562_v41 = vpack.c.bf16 %v1849_v40, %v1848_v39 }
 0x205   :  { %2501 = vmatpush3.bf16.msra.mxu1 %v2498_v42  ;;  %v1850_v42 = vld [vmem:[%s3306_s9 + $0x90] sm:$0xff] }
 0x206   :  { %2503 = vmatprep.subr.bf16.mxu1 %v2502_v45  ;;  %v2566_v44 = vpack.c.bf16 %v1851_v43, %v1850_v42  ;;  %v1355_v42 = vld [vmem:[%s3308_s11] sm:$0xff]  ;;  %v1356_v43 = vld [vmem:[%s3308_s11 + $0x8] sm:$0xff] }
 0x209   :  { %2505 = vmatpush3.bf16.msra.mxu1 %v2502_v45  ;;  %v1058_v45 = vld [vmem:[%s3306_s9] sm:$0xff] }
 0x20a   :  { %2507 = vmatprep.subr.bf16.mxu1 %v2506_v48  ;;  %v2570_v47 = vpack.c.bf16 %v1059_v46, %v1058_v45  ;;  %v1357_v45 = vld [vmem:[%s3308_s11 + $0x10] sm:$0xff]  ;;  %v1358_v46 = vld [vmem:[%s3308_s11 + $0x18] sm:$0xff] }
 0x20d   :  { %2509 = vmatpush3.bf16.msra.mxu1 %v2506_v48  ;;  %v1841_v48 = vld [vmem:[%s3305_s8] ss:$0 sm:$0xff] }
 0x20e   :  { %2511 = vmatprep.subr.bf16.mxu1 %v2510_v51 }
 0x211   :  { %2513 = vmatpush3.bf16.msra.mxu1 %v2510_v51 }
 0x212   :  { %2551 = vmatprep.subr.bf16.mxu1 %v2550_v4 }
 0x214   :  { %2207 = vmatmul.mubr.msk.f32.vlgmr.msra.gmra.mrb[6].mxu1 %vm590_vm5, %v575_v33  ;;  %v2546_v33 = vpack.c.bf16 %v1837_v31, %v1836_v30  ;;  %v1873_v31 = vld [vmem:[%s3308_s11 + $0x50] sm:$0xff] }
 0x215   :  { %2553 = vmatpush3.bf16.msra.mxu1 %v2550_v4  ;;  %v1067_v4 = vld [vmem:[%s3306_s9 + $0x48] sm:$0xff] }
 0x216   :  { %2555 = vmatprep.subr.bf16.mxu1 %v2554_v6  ;;  %v2586_v5 = vpack.c.bf16 %v1067_v4, %v1066_v3  ;;  %v1684_v3 = vld [vmem:[%s3311_s14 + $0x18] sm:$0xff] }
 0x219   :  { %2557 = vmatpush3.bf16.msra.mxu1 %v2554_v6  ;;  %v1856_v6 = vld [vmem:[%s3306_s9 + $0xa0] sm:$0xff] }
 0x21a   :  { %2559 = vmatprep.subr.bf16.mxu1 %v2558_v38 }
 0x21d   :  { %2561 = vmatpush3.bf16.msra.mxu1 %v2558_v38 }
 0x21e   :  { %2563 = vmatprep.subr.bf16.mxu1 %v2562_v41 }
 0x221   :  { %2565 = vmatpush3.bf16.msra.mxu1 %v2562_v41 }
 0x222   :  { %2567 = vmatprep.subr.bf16.mxu1 %v2566_v44 }
 0x225   :  { %2569 = vmatpush3.bf16.msra.mxu1 %v2566_v44  ;;  %v2620_v44 = vpack.c.bf16 %v1356_v43, %v1355_v42 }
 0x226   :  { %2571 = vmatprep.subr.bf16.mxu1 %v2570_v47 }
 0x2cb   :  { %v2177_v7 = vpop.f32.mrb[4].mxu1 }
 0x2cc   :  { %v663_v8 = vpop.f32.mrb[5].mxu1 }
 0x2e7   :  { %v2208_v9 = vpop.f32.mrb[6].mxu1 }
 0x2e8   :  { %v762_v10 = vmax.f32 %v2177_v7, %v2208_v9  ;;  %v752_v11 = vpop.f32.mrb[7].mxu1  ;;  %v1857_v7 = vld [vmem:[%s3306_s9 + $0xa8] sm:$0xff]  ;;  %v1858_v9 = vld [vmem:[%s3306_s9 + $0xb0] sm:$0xff] }
 0x2e9   :  { %v761_v12 = vmax.f32 %v663_v8, %v752_v11  ;;  %v2590_v8 = vpack.c.bf16 %v1857_v7, %v1856_v6 }
 0x2ea   :  { %766 = vst.msk [vmem:[#allocation2 + $0x8] sm:$0x3f] %vm765_vm6, %v762_v10  ;;  %v1859_v10 = vld [vmem:[%s3306_s9 + $0xb8] sm:$0xff] }
 0x2eb   :  { %764 = vst.msk [vmem:[#allocation2] sm:$0xff] %vm763_vm7, %v761_v12  ;;  %v2594_v11 = vpack.c.bf16 %v1859_v10, %v1858_v9 }
 0x2f1   :  { %v777_v17 = vld [vmem:[#allocation2 + $0x9] sm:$0xf] }
 0x2f2   :  { %v776_v15 = vld [vmem:[#allocation2 + $0x1] sm:$0xff]  ;;  %v949_v35 = vld [vmem:[#allocation2 + $0xa] sm:$0xf] }
 0x2f3   :  { %2223 = vmatprep.mubr.msk.f32.mxu0 %vm763_vm7, %v776_v15  ;;  %v767_v20 = vld [vmem:[#allocation2] sm:$0xff]  ;;  %v768_v29 = vld [vmem:[#allocation2 + $0x8] sm:$0xf] }
 0x2f4   :  { %2224 = vmatmul.mubr.msk.f32.vlgmr.msra.gmra.mrb[4].mxu0 %vm763_vm7, %v777_v17  ;;  %v948_v32 = vld [vmem:[#allocation2 + $0x2] sm:$0xff]  ;;  %v1862_v17 = vld [vmem:[%s3306_s9 + $0xd0] sm:$0xff] }
 0x2f5   :  { %2529 = vmatpush3.bf16.msra.mxu0 %v2526_v0  ;;  %2240 = vmatprep.mubr.msk.f32.mxu0 %vm763_vm7, %v767_v20  ;;  %v1064_v0 = vld [vmem:[%s3306_s9 + $0x30] sm:$0xff]  ;;  %v2602_v19 = vpack.c.bf16 %v1863_v18, %v1862_v17  ;;  %v1864_v20 = vld [vmem:[%s3306_s9 + $0xe0] sm:$0xff] }
 0x2f6   :  { %2531 = vmatprep.subr.bf16.mxu0 %v2530_v16  ;;  %v2582_v2 = vpack.c.bf16 %v1065_v1, %v1064_v0  ;;  %v1682_v0 = vld [vmem:[%s3311_s14 + $0x8] sm:$0xff]  ;;  %v1683_v1 = vld [vmem:[%s3311_s14 + $0x10] sm:$0xff] }
 0x2f7   :  { %v2641_v4 = vpack.c.bf16 %v1684_v3, %v1683_v1 }
 0x2f9   :  { %2533 = vmatpush3.bf16.msra.mxu0 %v2530_v16  ;;  %v2598_v16 = vpack.c.bf16 %v1861_v14, %v1860_v13 }
 0x2fa   :  { %2535 = vmatprep.subr.bf16.mxu0 %v2534_v21 }
 0x2fd   :  { %2537 = vmatpush3.bf16.msra.mxu0 %v2534_v21  ;;  %v1865_v21 = vld [vmem:[%s3306_s9 + $0xe8] sm:$0xff] }
 0x2fe   :  { %2238 = vmatprep.subr.mxu0 %v775_v22 }
 0x301   :  { %2239 = vmatpush3.msra.mxu0 %v775_v22  ;;  %v2606_v22 = vpack.c.bf16 %v1865_v21, %v1864_v20 }
 0x302   :  { %2241 = vmatmul.mubr.msk.f32.vlgmr.msra.gmra.mrb[4].mxu0 %vm763_vm7, %v768_v29  ;;  %2539 = vmatprep.subr.bf16.mxu0 %v2538_v27  ;;  %v1872_v29 = vld [vmem:[%s3308_s11 + $0x48] sm:$0xff] }
 0x303   :  { %2541 = vmatpush3.bf16.msra.mxu0 %v2538_v27  ;;  %2257 = vmatprep.mubr.msk.f32.mxu0 %vm763_vm7, %v948_v32  ;;  %v2689_v27 = vmov 0.0|0.0   ;;  %v1874_v32 = vld [vmem:[%s3308_s11 + $0x58] sm:$0xff] }
 0x304   :  { %2543 = vmatprep.subr.bf16.mxu0 %v2542_v28 }
 0x307   :  { %2545 = vmatpush3.bf16.msra.mxu0 %v2542_v28  ;;  %v1871_v28 = vld [vmem:[%s3308_s11 + $0x40] sm:$0xff] }
 0x308   :  { %2547 = vmatprep.subr.bf16.mxu0 %v2546_v33  ;;  %v2614_v30 = vpack.c.bf16 %v1872_v29, %v1871_v28 }
 0x30b   :  { %2549 = vmatpush3.bf16.msra.mxu0 %v2546_v33  ;;  %v2617_v33 = vpack.c.bf16 %v1874_v32, %v1873_v31 }
 0x30c   :  { %2255 = vmatprep.subr.mxu0 %v1838_v34 }
 0x30f   :  { %2256 = vmatpush3.msra.mxu0 %v1838_v34  ;;  %v2691_v34 = vmov 0.0  }
 0x310   :  { %2258 = vmatmul.mubr.msk.f32.vlgmr.msra.gmra.mrb[4].mxu0 %vm763_vm7, %v949_v35  ;;  %2610 = vmatprep.subr.bf16.mxu0 %v2689_v27  ;;  %v1868_v35 = vld [vmem:[%s3307_s10] ss:$0 sm:$0xff] }
 0x311   :  { %2612 = vmatpush3.bf16.msra.mxu0 %v2611_v26  ;;  %2341 = vmatprep.mubr.msk.f32.mxu0 %vm2690_vm10, %v2691_v34 }
 0x312   :  { %2613 = vmatprep.subr.bf16.mxu0 %v2689_v27 }
 0x315   :  { %2615 = vmatpush3.bf16.msra.mxu0 %v2614_v30 }
 0x316   :  { %2616 = vmatprep.subr.bf16.mxu0 %v2689_v27 }
 0x319   :  { %2618 = vmatpush3.bf16.msra.mxu0 %v2617_v33 }
 0x31a   :  { %2619 = vmatprep.subr.bf16.mxu0 %v2689_v27 }
 0x3e3   :  { %v2259_v49 = vpop.f32.mrb[4].mxu0 }
 0x3e4   :  { %v1049_v50 = vadd.f32 %v2259_v49, %v1841_v48  ;;  %v1030_v51 = vpop.f32.mrb[5].mxu0  ;;  %v1359_v49 = vld [vmem:[%s3308_s11 + $0x20] sm:$0xff] }
 0x3e5   :  { %v1048_v52 = vadd.f32 %v1841_v48, %v1030_v51  ;;  %v2623_v48 = vpack.c.bf16 %v1358_v46, %v1357_v45 }
 0x3e6   :  { %v1051_v53 = vmax.f32 %v1049_v50, 0.0  ;;  %v1360_v50 = vld [vmem:[%s3308_s11 + $0x28] sm:$0xff] }
 0x3e7   :  { %v1050_v54 = vmax.f32 %v1048_v52, 0.0  ;;  %v2626_v51 = vpack.c.bf16 %v1360_v50, %v1359_v49  ;;  %v1877_v52 = vld [vmem:[%s3308_s11 + $0x60] sm:$0xff] }
 0x3e8   :  { %1055 = vst.msk [vmem:[#allocation3 + $0x8] sm:$0xf] %vm1054_vm8, %v1051_v53  ;;  %v1878_v53 = vld [vmem:[%s3308_s11 + $0x68] sm:$0xff] }
 0x3e9   :  { %1053 = vst.msk [vmem:[#allocation3] sm:$0xff] %vm1052_vm9, %v1050_v54  ;;  %v2629_v54 = vpack.c.bf16 %v1878_v53, %v1877_v52 }
 0x3ef   :  { %v1069_v59 = vld [vmem:[#allocation3 + $0x9] sm:$0x3] }
 0x3f0   :  { %v1068_v57 = vld [vmem:[#allocation3 + $0x1] sm:$0xff]  ;;  %v1244_v23 = vld [vmem:[#allocation3 + $0xa] sm:$0x3] }
 0x3f1   :  { %2280 = vmatprep.mubr.msk.f32.mxu1 %vm1052_vm9, %v1068_v57  ;;  %v1056_v62 = vld [vmem:[#allocation3] sm:$0xff]  ;;  %v1057_v12 = vld [vmem:[#allocation3 + $0x8] sm:$0x3] }
 0x3f2   :  { %2281 = vmatmul.mubr.msk.f32.vlgmr.msra.gmra.mrb[8].mxu1 %vm1052_vm9, %v1069_v59  ;;  %v1243_v15 = vld [vmem:[#allocation3 + $0x2] sm:$0xff]  ;;  %v1881_v59 = vld [vmem:[%s3308_s11 + $0x80] sm:$0xff] }
 0x3f3   :  { %2573 = vmatpush3.bf16.msra.mxu1 %v2570_v47  ;;  %2303 = vmatprep.mubr.msk.f32.mxu1 %vm1052_vm9, %v1056_v62  ;;  %v2635_v61 = vpack.c.bf16 %v1882_v60, %v1881_v59 }
 0x3f4   :  { %2575 = vmatprep.subr.bf16.mxu1 %v2574_v58 }
 0x3f7   :  { %2577 = vmatpush3.bf16.msra.mxu1 %v2574_v58  ;;  %v2632_v58 = vpack.c.bf16 %v1880_v56, %v1879_v55 }
 0x3f8   :  { %2579 = vmatprep.subr.bf16.mxu1 %v2578_v63 }
 0x3fb   :  { %2581 = vmatpush3.bf16.msra.mxu1 %v2578_v63  ;;  %v1681_v63 = vld [vmem:[%s3311_s14] sm:$0xff] }
 0x3fc   :  { %2583 = vmatprep.subr.bf16.mxu1 %v2582_v2 }
 0x3ff   :  { %2585 = vmatpush3.bf16.msra.mxu1 %v2582_v2  ;;  %v2638_v2 = vpack.c.bf16 %v1682_v0, %v1681_v63 }
 0x400   :  { %2587 = vmatprep.subr.bf16.mxu1 %v2586_v5 }
 0x403   :  { %2589 = vmatpush3.bf16.msra.mxu1 %v2586_v5 }
 0x404   :  { %2591 = vmatprep.subr.bf16.mxu1 %v2590_v8 }
 0x406   :  { %2304 = vmatmul.mubr.msk.f32.vlgmr.msra.gmra.mrb[8].mxu1 %vm1052_vm9, %v1057_v12 }
 0x407   :  { %2593 = vmatpush3.bf16.msra.mxu1 %v2590_v8  ;;  %2326 = vmatprep.mubr.msk.f32.mxu1 %vm1052_vm9, %v1243_v15 }
 0x408   :  { %2595 = vmatprep.subr.bf16.mxu1 %v2594_v11 }
 0x40b   :  { %2597 = vmatpush3.bf16.msra.mxu1 %v2594_v11  ;;  %v1884_v11 = vld [vmem:[%s3309_s12] ss:$0 sm:$0xff]  ;;  %s2692_s12 = smov [#allocation5]  }
 0x40c   :  { %2599 = vmatprep.subr.bf16.mxu1 %v2598_v16  ;;  %s1774_s25 = sshll.u32 %s2692_s12, 4  ;;  %s1775_s25 = int_to_ptr.vmem [resolvable:$true] %s1774_s25 }
 0x40d   :  { %p2669_p1 = scmp.lt.s32.totalorder %s1775_s25, %s1775_s25 }
 0x40f   :  { %2601 = vmatpush3.bf16.msra.mxu1 %v2598_v16  ;;  %v1606_v16 = vld [vmem:[%s3310_s13] sm:$0x3]  ;;  %s2664_s13 = scalar_lea.vmem %s1775_s25, 32 }
 0x410   :  { %2603 = vmatprep.subr.bf16.mxu1 %v2602_v19  ;;  %p2665_p0 = scmp.ne.s32.totalorder %s1775_s25, %s2664_s13  ;;  %p2670_p2 = scmp.lt.s32.totalorder %s2664_s13, %s2664_s13 }
 0x412   :  { %p2671_p3 = por %p2670_p2, %p2669_p1 }
 0x413   :  { %2605 = vmatpush3.bf16.msra.mxu1 %v2602_v19  ;;  %v1886_v19 = vld [vmem:[%s3312_s15] ss:$0 sm:$0xff] }
 0x414   :  { %2607 = vmatprep.subr.bf16.mxu1 %v2606_v22  ;;  %p2672_p4 = pnand %p2671_p3, %p2665_p0 }
 0x417   :  { %2609 = vmatpush3.bf16.msra.mxu1 %v2606_v22 }
 0x418   :  { %2374 = vmatprep.subr.mxu1 %v2691_v34 }
 0x41a   :  { %2327 = vmatmul.mubr.msk.f32.vlgmr.msra.gmra.mrb[8].mxu1 %vm1052_vm9, %v1244_v23 }
 0x41b   :  { %2376 = vmatprep.mubr.msk.f32.mxu1 %vm2690_vm10, %v2691_v34 }
 0x4ed   :  { %v2328_v36 = vpop.f32.mrb[8].mxu1 }
 0x4ee   :  { %v1347_v37 = vadd.f32 %v2328_v36, %v1868_v35  ;;  %v1328_v38 = vpop.f32.mrb[9].mxu1 }
 0x4ef   :  { %v1346_v39 = vadd.f32 %v1868_v35, %v1328_v38 }
 0x4f0   :  { %v1349_v40 = vmax.f32 %v1347_v37, 0.0 }
 0x4f1   :  { %v1348_v41 = vmax.f32 %v1346_v39, 0.0 }
 0x4f2   :  { %1353 = vst.msk [vmem:[#allocation4 + $0x8] sm:$0x3] %vm1352_vm11, %v1349_v40 }
 0x4f3   :  { %1351 = vst.msk [vmem:[#allocation4] sm:$0xff] %vm1350_vm12, %v1348_v41 }
 0x4fa   :  { %v1361_v47 = vld [vmem:[#allocation4 + $0x1] sm:$0xff] }
 0x4fb   :  { %2342 = vmatmul.mubr.msk.f32.vlgmr.msra.gmra.mrb[6].mxu0 %vm1350_vm12, %v1361_v47  ;;  %v1354_v57 = vld [vmem:[#allocation4] sm:$0xff] }
 0x4fc   :  { %2621 = vmatpush3.bf16.msra.mxu0 %v2620_v44  ;;  %2356 = vmatprep.mubr.msk.f32.mxu0 %vm2690_vm10, %v2691_v34  ;;  %v1515_v62 = vld [vmem:[#allocation4 + $0x2] sm:$0xff] }
 0x4fd   :  { %2622 = vmatprep.subr.bf16.mxu0 %v2689_v27 }
 0x500   :  { %2624 = vmatpush3.bf16.msra.mxu0 %v2623_v48 }
 0x501   :  { %2625 = vmatprep.subr.bf16.mxu0 %v2689_v27 }
 0x504   :  { %2627 = vmatpush3.bf16.msra.mxu0 %v2626_v51 }
 0x505   :  { %2628 = vmatprep.subr.bf16.mxu0 %v2689_v27 }
 0x507   :  { %2357 = vmatmul.mubr.msk.f32.vlgmr.msra.gmra.mrb[8].mxu0 %vm1350_vm12, %v1354_v57 }
 0x508   :  { %2630 = vmatpush3.bf16.msra.mxu0 %v2629_v54  ;;  %2371 = vmatprep.mubr.msk.f32.mxu0 %vm2690_vm10, %v2691_v34 }
 0x509   :  { %2631 = vmatprep.subr.bf16.mxu0 %v2689_v27 }
 0x50c   :  { %2633 = vmatpush3.bf16.msra.mxu0 %v2632_v58 }
 0x50d   :  { %2634 = vmatprep.subr.bf16.mxu0 %v2689_v27 }
 0x510   :  { %2636 = vmatpush3.bf16.msra.mxu0 %v2635_v61 }
 0x511   :  { %2637 = vmatprep.subr.bf16.mxu0 %v2689_v27 }
 0x513   :  { %2372 = vmatmul.mubr.msk.f32.vlgmr.msra.gmra.mrb[10].mxu0 %vm1350_vm12, %v1515_v62 }
 0x514   :  { %2387 = vmatprep.mubr.msk.f32.mxu0 %vm2690_vm10, %v2691_v34  ;;  %2639 = vmatpush3.bf16.msra.mxu0 %v2638_v2 }
 0x515   :  { %2640 = vmatprep.subr.bf16.mxu0 %v2689_v27 }
 0x518   :  { %2642 = vmatpush3.bf16.msra.mxu0 %v2641_v4 }
 0x5ce   :  { %v1438_v5 = vpop.f32.mrb[6].mxu0 }
 0x5cf   :  { %v2343_v6 = vpop.f32.mrb[7].mxu0 }
 0x5da   :  { %v1511_v7 = vpop.f32.mrb[8].mxu0 }
 0x5db   :  { %v1512_v8 = vadd.f32 %v1511_v7, %v1438_v5  ;;  %v2358_v9 = vpop.f32.mrb[9].mxu0 }
 0x5e6   :  { %v1592_v10 = vpop.f32.mrb[10].mxu0 }
 0x5e7   :  { %v1596_v12 = vadd.f32 %v1592_v10, %v1512_v8  ;;  %v2373_v13 = vpop.f32.mrb[11].mxu0 }
 0x5e9   :  { %v1604_v14 = vadd.f32 %v1884_v11, %v1596_v12 }
 0x5eb   :  { %v1605_v15 = vmax.f32 %v1604_v14, 0.0 }
 0x5ed   :  { %2375 = vmatpush3.msra.mxu1 %v1605_v15 }
 0x5ee   :  { %2377 = vmatmul.mubr.msk.f32.vlgmr.msra.gmra.mrb[10].mxu1 %vm1607_vm13, %v1606_v16 }
 0x6c1   :  { %v1677_v17 = vpop.f32.mrb[10].mxu1 }
 0x6c2   :  { %v2378_v18 = vpop.f32.mrb[11].mxu1  ;;  %2388 = vmatmul.mubr.msk.f32.vlgmr.msra.gmra.mrb[12].mxu0 %vm1692_vm14, %v1677_v17 }
 0x795   :  { %v1762_v20 = vpop.f32.mrb[12].mxu0 }
 0x796   :  { %v1763_v21 = vadd.f32 %v1886_v19, %v1762_v20  ;;  %v2389_v22 = vpop.f32.mrb[13].mxu0 }
 0x798   :  { %1767 = vst.msk [vmem:[#allocation5] sm:$0x3] %vm1766_vm15, %v1763_v21 }
 0x799   :  { %2675 = shalt.err (!%p2672_p4)
}
 0x79a   :  { %s2676_s4 = scalar_lea.hbm %s3313_s16, 32 }
 0x79b   :  { %p2677_p5 = scmp.ne.s32.totalorder %s3313_s16, %s2676_s4  ;;  %p2680_p6 = scmp.lt.u32.totalorder %s2676_s4, %s3313_s16 }
 0x79d   :  { %p2682_p7 = pnand %p2680_p6, %p2677_p5 }
 0x79f   :  { %2685 = shalt.err (!%p2682_p7)
}
 0x7a0   :  { %1777 = dma.vmem_to_hbm [thread:$0]  %s1775_s25, 32, %s3313_s16, [#allocation6]  }
 0x7a1   :  { %2686 = dma.done.wait [#allocation6], 32  }
 0x7a2   :  { %2687 = vsyncadd [#allocation6], 4294967264 }
 0x7a3   :  { %1781 = vsyncpa [#allocation6], 1 }

</bundles_post_ra>
